<compile_context>
chip_gen: v5e
topology: v5e:2x2
jax: 0.10.0
libtpu: 0.0.40
codegen_flags: <defaults>
</compile_context>

<pallas_src>
import functools

import jax
import jax.numpy as jnp
from jax import lax
from jax.experimental import pallas as pl
from jax.experimental.pallas import tpu as pltpu

_LANES = 128


def _vae_loss_kernel(mu_ref, logvar_ref, xhat_ref, x_ref, out_ref, acc_ref,
                     *, n_steps, n_rows, inv_n, need_row_mask, tile_r):
    i = pl.program_id(0)

    @pl.when(i == 0)
    def _init():
        acc_ref[...] = jnp.zeros_like(acc_ref)
        out_ref[0] = jnp.float32(0.0)

    # Streaming SSE accumulation: pure VPU work, co-issues under the DMA slots.
    d = xhat_ref[...].astype(jnp.float32) - x_ref[...].astype(jnp.float32)
    sq = d * d
    if need_row_mask:
        # Last grid step's block may extend past the true row count; zero those
        # rows (select, so any garbage/NaN in the OOB region is dropped).
        row = lax.broadcasted_iota(jnp.int32, (tile_r, _LANES), 0)
        sq = jnp.where(i * tile_r + row < n_rows, sq, 0.0)
    acc_ref[...] += sq

    @pl.when(i == n_steps - 1)
    def _finalize():
        mu = mu_ref[...].astype(jnp.float32)
        lv = logvar_ref[...].astype(jnp.float32)
        # KL = -0.5 * sum(1 + log_var - mu^2 - exp(log_var)); the PyTorch
        # .sum(-1)/.mean() afterwards are no-ops on a scalar.
        kl = -0.5 * jnp.sum(1.0 + lv - mu * mu - jnp.exp(lv))
        out_ref[0] = kl + jnp.sum(acc_ref[...]) * inv_n


def vae_loss(mu, log_var, x_hat_param, x, *, max_tile_rows=4096):
    """ELBO = KL(mu, log_var) + MSE(x_hat, x), matching the PyTorch VAE_Loss."""
    n = x.size
    assert x_hat_param.size == n, "x_hat and x must have the same numel"
    max_tile_rows = max(8, (max_tile_rows // 8) * 8)

    flat_x = x.reshape(-1)
    flat_xh = x_hat_param.reshape(-1)

    rows = -(-n // _LANES)
    padded = rows * _LANES
    if padded != n:
        # Only the ragged tail (< 128 elements) is padded with exact zeros
        # (contributes 0 to the SSE); skipped entirely when lane-aligned.
        flat_x = jnp.pad(flat_x, (0, padded - n))
        flat_xh = jnp.pad(flat_xh, (0, padded - n))
    x2 = flat_x.reshape(rows, _LANES)
    xh2 = flat_xh.reshape(rows, _LANES)

    mu2 = mu.reshape(mu.shape[0], -1)
    lv2 = log_var.reshape(log_var.shape[0], -1)

    if rows <= max_tile_rows:
        tile_r = rows            # single full-array block (always legal)
    else:
        tile_r = max_tile_rows   # multiple of 8; 2 MiB/stream at 4096 rows
    n_steps = -(-rows // tile_r)
    need_row_mask = (n_steps * tile_r != rows)

    kernel = functools.partial(
        _vae_loss_kernel,
        n_steps=n_steps,
        n_rows=rows,
        inv_n=1.0 / float(n),
        need_row_mask=need_row_mask,
        tile_r=tile_r,
    )

    out = pl.pallas_call(
        kernel,
        out_shape=jax.ShapeDtypeStruct((1,), jnp.float32),
        grid=(n_steps,),
        in_specs=[
            pl.BlockSpec(mu2.shape, lambda i: (0, 0)),           # mu (resident)
            pl.BlockSpec(lv2.shape, lambda i: (0, 0)),           # log_var (resident)
            pl.BlockSpec((tile_r, _LANES), lambda i: (i, 0)),    # x_hat stream
            pl.BlockSpec((tile_r, _LANES), lambda i: (i, 0)),    # x stream
        ],
        out_specs=pl.BlockSpec(memory_space=pltpu.SMEM),         # resident scalar
        scratch_shapes=[pltpu.VMEM((tile_r, _LANES), jnp.float32)],
        compiler_params=pltpu.CompilerParams(
            dimension_semantics=("arbitrary",),                  # reduction axis
            vmem_limit_bytes=32 * 1024 * 1024,
        ),
    )(mu2, lv2, xh2, x2)
    return out[0]


def _reference(mu, log_var, x_hat_param, x):
    kl = -0.5 * jnp.sum(1.0 + log_var - jnp.square(mu) - jnp.exp(log_var))
    diff = x_hat_param.reshape(-1) - x.reshape(-1)
    return kl + jnp.mean(diff * diff)


if __name__ == "__main__":
    key = jax.random.PRNGKey(0)
    k1, k2, k3, k4 = jax.random.split(key, 4)

    B, D = 2, 32               # latent: (batch, latent_dim)
    N, C, H, W = 2, 4, 16, 16  # data: NCHW

    mu = jax.random.normal(k1, (B, D), dtype=jnp.float32)
    log_var = 0.1 * jax.random.normal(k2, (B, D), dtype=jnp.float32)
    x = jax.random.normal(k3, (N, C, H, W), dtype=jnp.float32)
    x_hat = x + 0.05 * jax.random.normal(k4, (N, C, H, W), dtype=jnp.float32)

    ref = _reference(mu, log_var, x_hat, x)

    # 1) default tiling (single block for this small input)
    elbo = jax.block_until_ready(vae_loss(mu, log_var, x_hat, x))
    assert jnp.allclose(elbo, ref, rtol=1e-5, atol=1e-5), (elbo, ref)

    # 2) same data, but force the multi-step pipelined/accumulator grid path
    elbo2 = jax.block_until_ready(vae_loss(mu, log_var, x_hat, x, max_tile_rows=8))
    assert jnp.allclose(elbo2, ref, rtol=1e-5, atol=1e-5), (elbo2, ref)

    # 3) ragged numel (not a multiple of 128) + partial last tile (row mask)
    xr = jax.random.normal(k3, (1, 1, 20, 127), dtype=jnp.float32)
    xhr = xr + 0.05 * jax.random.normal(k4, (1, 1, 20, 127), dtype=jnp.float32)
    refr = _reference(mu, log_var, xhr, xr)
    elbor = jax.block_until_ready(
        vae_loss(mu, log_var, xhr, xr, max_tile_rows=8))
    assert jnp.allclose(elbor, refr, rtol=1e-5, atol=1e-5), (elbor, refr)

    print("KERNEL_OK")
</pallas_src>

<mosaic_0001>
module attributes {stable_mosaic.version = 11 : i64} {
  func.func @_vae_loss_kernel(%arg0: i32, %arg1: memref<2x32xf32, #tpu.memory_space<vmem>>, %arg2: memref<2x32xf32, #tpu.memory_space<vmem>>, %arg3: memref<16x128xf32, #tpu.memory_space<vmem>>, %arg4: memref<16x128xf32, #tpu.memory_space<vmem>>, %arg5: memref<1xf32, #tpu.memory_space<smem>>, %arg6: memref<16x128xf32, #tpu.memory_space<vmem>>) attributes {dimension_semantics = [#tpu.dimension_semantics<arbitrary>], iteration_bounds = array<i64: 1>, scalar_prefetch = 0 : i64, scratch_operands = 1 : i64, tpu.core_type = #tpu.core_type<tc>, window_params = [{pipeline_mode = #tpu.pipeline_mode<synchronous>, transform_indices = @transform_0, window_bounds = array<i64: 2, 32>}, {pipeline_mode = #tpu.pipeline_mode<synchronous>, transform_indices = @transform_1, window_bounds = array<i64: 2, 32>}, {transform_indices = @transform_2, window_bounds = array<i64: 16, 128>}, {transform_indices = @transform_3, window_bounds = array<i64: 16, 128>}, {transform_indices = @transform_4, window_bounds = array<i64: 1>}]} {
    %c0_i32 = arith.constant 0 : i32
    %0 = arith.cmpi eq, %arg0, %c0_i32 : i32
    %1 = arith.extui %0 : i1 to i32
    %c0_i32_0 = arith.constant 0 : i32
    %2 = arith.cmpi ne, %1, %c0_i32_0 : i32
    scf.if %2 {
      %cst = arith.constant 0.000000e+00 : f32
      %13 = vector.broadcast %cst : f32 to vector<16x128xf32>
      %c0_10 = arith.constant 0 : index
      %c0_11 = arith.constant 0 : index
      %14 = vector.load %arg6[%c0_10, %c0_11] : memref<16x128xf32, #tpu.memory_space<vmem>>, vector<16x128xf32>
      tpu.vector_store %arg6[%c0_10, %c0_11], %13 {strides = array<i32>} : memref<16x128xf32, #tpu.memory_space<vmem>>, vector<16x128xf32>,
      %cst_12 = arith.constant 0.000000e+00 : f32
      %c0_13 = arith.constant 0 : index
      %15 = memref.load %arg5[%c0_13] : memref<1xf32, #tpu.memory_space<smem>>
      memref.store %cst_12, %arg5[%c0_13] : memref<1xf32, #tpu.memory_space<smem>>
    } else {
    }
    %c0 = arith.constant 0 : index
    %c0_1 = arith.constant 0 : index
    %3 = vector.load %arg3[%c0, %c0_1] : memref<16x128xf32, #tpu.memory_space<vmem>>, vector<16x128xf32>
    %c0_2 = arith.constant 0 : index
    %c0_3 = arith.constant 0 : index
    %4 = vector.load %arg4[%c0_2, %c0_3] : memref<16x128xf32, #tpu.memory_space<vmem>>, vector<16x128xf32>
    %5 = arith.subf %3, %4 : vector<16x128xf32>
    %6 = arith.mulf %5, %5 : vector<16x128xf32>
    %c0_4 = arith.constant 0 : index
    %c0_5 = arith.constant 0 : index
    %7 = vector.load %arg6[%c0_4, %c0_5] : memref<16x128xf32, #tpu.memory_space<vmem>>, vector<16x128xf32>
    %8 = arith.addf %7, %6 : vector<16x128xf32>
    %c0_6 = arith.constant 0 : index
    %c0_7 = arith.constant 0 : index
    %9 = vector.load %arg6[%c0_6, %c0_7] : memref<16x128xf32, #tpu.memory_space<vmem>>, vector<16x128xf32>
    tpu.vector_store %arg6[%c0_6, %c0_7], %8 {strides = array<i32>} : memref<16x128xf32, #tpu.memory_space<vmem>>, vector<16x128xf32>,
    %c0_i32_8 = arith.constant 0 : i32
    %10 = arith.cmpi eq, %arg0, %c0_i32_8 : i32
    %11 = arith.extui %10 : i1 to i32
    %c0_i32_9 = arith.constant 0 : i32
    %12 = arith.cmpi ne, %11, %c0_i32_9 : i32
    scf.if %12 {
      %c0_10 = arith.constant 0 : index
      %c0_11 = arith.constant 0 : index
      %13 = vector.load %arg1[%c0_10, %c0_11] : memref<2x32xf32, #tpu.memory_space<vmem>>, vector<2x32xf32>
      %c0_12 = arith.constant 0 : index
      %c0_13 = arith.constant 0 : index
      %14 = vector.load %arg2[%c0_12, %c0_13] : memref<2x32xf32, #tpu.memory_space<vmem>>, vector<2x32xf32>
      %cst = arith.constant 1.000000e+00 : f32
      %15 = vector.broadcast %cst : f32 to vector<2x32xf32>
      %16 = arith.addf %15, %14 : vector<2x32xf32>
      %17 = arith.mulf %13, %13 : vector<2x32xf32>
      %18 = arith.subf %16, %17 : vector<2x32xf32>
      %19 = math.exp %14 : vector<2x32xf32>
      %20 = arith.subf %18, %19 : vector<2x32xf32>
      %21 = vector.shape_cast %20 : vector<2x32xf32> to vector<1x2x32xf32>
      %cst_14 = arith.constant dense<0.000000e+00> : vector<1xf32>
      %22 = vector.multi_reduction <add>, %21, %cst_14 [1, 2] : vector<1x2x32xf32> to vector<1xf32>
      %23 = vector.shape_cast %22 : vector<1xf32> to vector<1x1x1xf32>
      %24 = vector.extract %23[0, 0, 0] : f32 from vector<1x1x1xf32>
      %cst_15 = arith.constant -5.000000e-01 : f32
      %25 = arith.mulf %cst_15, %24 : f32
      %c0_16 = arith.constant 0 : index
      %c0_17 = arith.constant 0 : index
      %26 = vector.load %arg6[%c0_16, %c0_17] : memref<16x128xf32, #tpu.memory_space<vmem>>, vector<16x128xf32>
      %27 = vector.shape_cast %26 : vector<16x128xf32> to vector<1x16x128xf32>
      %cst_18 = arith.constant dense<0.000000e+00> : vector<1xf32>
      %28 = vector.multi_reduction <add>, %27, %cst_18 [1, 2] : vector<1x16x128xf32> to vector<1xf32>
      %29 = vector.shape_cast %28 : vector<1xf32> to vector<1x1x1xf32>
      %30 = vector.extract %29[0, 0, 0] : f32 from vector<1x1x1xf32>
      %cst_19 = arith.constant 4.8828125E-4 : f32
      %31 = arith.mulf %30, %cst_19 : f32
      %32 = arith.addf %25, %31 : f32
      %c0_20 = arith.constant 0 : index
      %33 = memref.load %arg5[%c0_20] : memref<1xf32, #tpu.memory_space<smem>>
      memref.store %32, %arg5[%c0_20] : memref<1xf32, #tpu.memory_space<smem>>
    } else {
    }
    return
  }
  func.func @transform_0(%arg0: i32) -> (i32, i32) {
    %c0_i32 = arith.constant 0 : i32
    %c0_i32_0 = arith.constant 0 : i32
    %c0_i32_1 = arith.constant 0 : i32
    return %c0_i32, %c0_i32_0 : i32, i32
  }
  func.func @transform_1(%arg0: i32) -> (i32, i32) {
    %c0_i32 = arith.constant 0 : i32
    %c0_i32_0 = arith.constant 0 : i32
    %c0_i32_1 = arith.constant 0 : i32
    return %c0_i32, %c0_i32_0 : i32, i32
  }
  func.func @transform_2(%arg0: i32) -> (i32, i32) {
    %c0_i32 = arith.constant 0 : i32
    %c0_i32_0 = arith.constant 0 : i32
    return %arg0, %c0_i32 : i32, i32
  }
  func.func @transform_3(%arg0: i32) -> (i32, i32) {
    %c0_i32 = arith.constant 0 : i32
    %c0_i32_0 = arith.constant 0 : i32
    return %arg0, %c0_i32 : i32, i32
  }
  func.func @transform_4(%arg0: i32) -> i32 {
    %c0_i32 = arith.constant 0 : i32
    %c0_i32_0 = arith.constant 0 : i32
    return %c0_i32 : i32
  }
}

</mosaic_0001>

<bundles_post_ra>
// kernel: tpu_custom_call.1
= control target key start
LH: loop header
LB: loop body
LE: loop exit
PB: predicated region body
PF: predicated region fallthrough
CT: control target
= control target key end

     0   :  { %9 = vsyncpa [#allocation4], 0  ;;  %s333_s0 = inlined_call_operand.hbm [shape: f32[2,32], index: 0, kind: input, shape index: {}]   ;;  %s334_s1 = inlined_call_operand.hbm [shape: f32[2,32], index: 1, kind: input, shape index: {}]   ;;  %s335_s2 = inlined_call_operand.hbm [shape: f32[16,128], index: 2, kind: input, shape index: {}]   ;;  %s336_s3 = inlined_call_operand.hbm [shape: f32[16,128], index: 3, kind: input, shape index: {}]   ;;  %s337_s4 = inlined_call_operand.hbm [shape: f32[1], index: 4, kind: output, shape index: {}]  }
   0x1   :  { %10 = vsyncpa [#allocation7], 0 }
   0x2   :  { %11 = vsyncpa [#allocation10], 0  ;;  %s29_s17 = sshll.u32 %s334_s1, 4  ;;  %s30_s17 = int_to_ptr.hbm [resolvable:$true] %s29_s17 }
   0x3   :  { %12 = vsyncpa [#allocation5], 0  ;;  %s286_s18 = smov [#allocation6]   ;;  %s18_s22 = sshll.u32 %s333_s0, 4  ;;  %s19_s22 = int_to_ptr.hbm [resolvable:$true] %s18_s22 }
   0x4   :  { %s31_s19 = sshll.u32 %s286_s18, 4  ;;  %s287_s23 = smov [#allocation3]   ;;  %s32_s19 = int_to_ptr.vmem [resolvable:$true] %s31_s19 }
   0x5   :  { %34 = dma.hbm_to_vmem [thread:$0]  %s30_s17, 32, %s32_s19, [#allocation7]  }
   0x6   :  { %s20_s24 = sshll.u32 %s287_s23, 4  ;;  %s39_s27 = sshll.u32 %s335_s2, 4  ;;  %s21_s24 = int_to_ptr.vmem [resolvable:$true] %s20_s24  ;;  %s40_s27 = int_to_ptr.hbm [resolvable:$true] %s39_s27 }
   0x7   :  { %23 = dma.hbm_to_vmem [thread:$0]  %s19_s22, 32, %s21_s24, [#allocation4]  }
   0x8   :  { %s288_s1 = smov [#allocation8]   ;;  %s52_s5 = sshll.u32 %s336_s3, 4  ;;  %s53_s5 = int_to_ptr.hbm [resolvable:$true] %s52_s5 }
   0x9   :  { %s41_s28 = sshll.u32 %s288_s1, 4  ;;  %s289_s6 = smov 128   ;;  %s42_s28 = int_to_ptr.vmem [resolvable:$true] %s41_s28 }
   0xa   :  { %s290_s0 = smov 8   ;;  %s291_s7 = smov [#allocation9]  }
   0xb   :  { %47 = dma.hbm_to_vmem [thread:$0]  %s40_s27, 256, %s42_s28, [#allocation7], %s289_s6, %s289_s6, %s290_s0  }
   0xc   :  { %s54_s8 = sshll.u32 %s291_s7, 4  ;;  %s55_s8 = int_to_ptr.vmem [resolvable:$true] %s54_s8 }
   0xd   :  { %60 = dma.hbm_to_vmem [thread:$0]  %s53_s5, 256, %s55_s8, [#allocation10], %s289_s6, %s289_s6, %s290_s0  }
   0xe   :  { %278 = dma.done.wait [#allocation4], 32  }
   0xf   :  { %279 = vsyncadd [#allocation4], 4294967264 }
  0x10   :  { %280 = dma.done.wait [#allocation7], 288  }
  0x11   :  { %281 = vsyncadd [#allocation7], 4294967008 }
  0x12   :  { %282 = dma.done.wait [#allocation10], 256  }
  0x13   :  { %283 = vsyncadd [#allocation10], 4294967040  ;;  %v102_v0 = vld [vmem:[#allocation3] sm:$0x3]  ;;  %v103_v1 = vld [vmem:[#allocation6] sm:$0x3] }
  0x14   :  { %v107_v2 = vmul.f32 1.442695, %v103_v1  ;;  %v104_v3 = vadd.f32 1.0, %v103_v1  ;;  %v105_v4 = vmul.f32 %v102_v0, %v102_v0  ;;  %v85_v5 = vld [vmem:[#allocation8] sm:$0xff]  ;;  %v86_v7 = vld [vmem:[#allocation8 + $0x8] sm:$0xff]  ;;  %v87_v8 = vld [vmem:[#allocation9] sm:$0xff] }
  0x15   :  { %v88_v9 = vld [vmem:[#allocation9 + $0x8] sm:$0xff]  ;;  %vm110_vm0 = vcmask 254976   ;;  %v89_v11 = vsub.f32 %v85_v5, %v87_v8  ;;  %s143_s10 = sshll.u32 %s337_s4, 4  ;;  %s292_s15 = smov [#allocation11]   ;;  %s144_s10 = int_to_ptr.hbm [resolvable:$true] %s143_s10 }
  0x16   :  { %168 = vpow2.f32 %v107_v2  ;;  %v106_v6 = vsub.f32 %v104_v3, %v105_v4  ;;  %v90_v12 = vsub.f32 %v86_v7, %v88_v9 }
  0x17   :  { %v91_v15 = vmul.f32 %v89_v11, %v89_v11 }
  0x18   :  { %v92_v16 = vmul.f32 %v90_v12, %v90_v12 }
  0x1a   :  { %v124_v17 = vadd.f32 %v92_v16, %v91_v15 }
  0x1c   :  { %v169_v10 = vpop.eup %168 }
  0x1d   :  { %v109_v13 = vsub.f32 %v106_v6, %v169_v10 }
  0x1f   :  { %v111_v14 = vsel %vm110_vm0, %v109_v13, 0.0 }
  0x20   :  { %112 = vadd.xlane.f32.xlu0 %v111_v14 }
  0x28   :  { %125 = vadd.xlane.f32.xlu0 %v124_v17 }
  0x93   :  { %v113_v18 = vpop.xlane.xlu0 %112 }
  0x94   :  { %v114_v19 = vrot.slane %v113_v18, 4 }
  0x96   :  { %v115_v20 = vadd.f32 %v114_v19, %v113_v18 }
  0x98   :  { %v116_v21 = vrot.slane %v115_v20, 2 }
  0x9a   :  { %v117_v22 = vadd.f32 %v116_v21, %v115_v20 }
  0x9b   :  { %v126_v23 = vpop.xlane.xlu0 %125 }
  0x9c   :  { %v127_v24 = vrot.slane %v126_v23, 4  ;;  %v118_v25 = vrot.slane %v117_v22, 1 }
  0x9e   :  { %v128_v26 = vadd.f32 %v127_v24, %v126_v23  ;;  %v119_v27 = vadd.f32 %v118_v25, %v117_v22 }
  0xa0   :  { %v129_v28 = vrot.slane %v128_v26, 2  ;;  %156 = vpush %v119_v27 }
  0xa2   :  { %v130_v29 = vadd.f32 %v129_v28, %v128_v26 }
  0xa4   :  { %v131_v30 = vrot.slane %v130_v29, 1 }
  0xa6   :  { %v132_v31 = vadd.f32 %v131_v30, %v130_v29 }
  0xa8   :  { %158 = vpush %v132_v31 }
  0xd1   :  { %s157_s2 = spop %156 }
  0xd2   :  { %s121_s11 = smul.f32 -0.5, %s157_s2 }
  0xd9   :  { %s159_s12 = spop %158 }
  0xda   :  { %s134_s13 = smul.f32 0.00048828125, %s159_s12 }
  0xdc   :  { %s135_s14 = sadd.f32 %s134_s13, %s121_s11 }
  0xde   :  { %137 = sst [smem:[#allocation11]] %s135_s14 }
  0xdf   :  { %146 = dma.smem_to_hbm %s292_s15, 16, %s144_s10, [#allocation5]  }
  0xe0   :  { %284 = dma.done.wait [#allocation5], 16  }
  0xe1   :  { %285 = vsyncadd [#allocation5], 4294967280 }
  0xe2   :  { %151 = sfence }
  0xe3   :  { %152 = vsyncpa [#allocation4], 1 }
  0xe4   :  { %153 = vsyncpa [#allocation7], 1 }
  0xe5   :  { %154 = vsyncpa [#allocation10], 1 }
  0xe6   :  { %155 = vsyncpa [#allocation5], 1 }

</bundles_post_ra>
